<compile_context>
chip_gen: v7x
topology: tpu7x:2x2x1
jax: 0.10.0
libtpu: 0.0.40
codegen_flags: <defaults>
</compile_context>

<pallas_src>
import functools

import jax
import jax.numpy as jnp
from jax.experimental import pallas as pl
from jax.experimental.pallas import tpu as pltpu


def _round_up(x: int, m: int) -> int:
    return ((x + m - 1) // m) * m


def _sublane_pack(dtype) -> int:
    # sublane packing granularity per dtype width (f32:8, bf16:16, int8/fp8:32)
    return {4: 8, 2: 16, 1: 32}.get(jnp.dtype(dtype).itemsize, 8)


# ---------------------------------------------------------------------------
# Fast path: whole padded tensor resident in VMEM -> scores + global softmax +
# scaling in a single kernel (1 HBM read + 1 HBM write of the big tensor).
# ---------------------------------------------------------------------------
def _fused_single_kernel(img_ref, proj_ref, out_ref, *, valid_b: int):
    img = img_ref[...]                                             # (Bp, Dp), input dtype
    proj = proj_ref[...]                                           # (1,  Dp), input dtype
    if img.dtype == jnp.float32:
        # f32: VPU multiply + cross-lane reduce is exact and needs no upcast.
        scores = jnp.sum(img * proj, axis=-1, keepdims=True)      # (Bp, 1) f32
    else:
        # Narrow dtypes (bf16/int8): use the otherwise idle MXU natively with
        # f32 accumulation -> no materialized f32 copy of the resident tile.
        scores = jax.lax.dot_general(
            img, proj, (((1,), (1,)), ((), ())),
            preferred_element_type=jnp.float32)                   # (Bp, 1) f32
    # Padded batch rows must not contribute to the softmax over B.
    row = jax.lax.broadcasted_iota(jnp.int32, scores.shape, 0)
    scores = jnp.where(row < valid_b, scores.astype(jnp.float32), -jnp.inf)

    m = jnp.max(scores, axis=0, keepdims=True)                    # (1, 1)
    e = jnp.exp(scores - m)                                       # (Bp, 1)
    inv = pl.reciprocal(jnp.sum(e, axis=0, keepdims=True))        # (1, 1)
    w = e * inv                                                    # (Bp, 1) f32

    # One downcast of the tiny weight column; the big multiply stays in dtype.
    out_ref[...] = (img * w.astype(img.dtype)).astype(out_ref.dtype)


# ---------------------------------------------------------------------------
# Tiled path: softmax weights precomputed in the wrapper; the kernel is a pure
# stream (load tile, one VPU multiply, store tile) -> only HBM DMA to hide.
# ---------------------------------------------------------------------------
def _scale_kernel(w_ref, img_ref, out_ref):
    img = img_ref[...]                                             # (tb, Dp), input dtype
    out_ref[...] = (img * w_ref[...].astype(img.dtype)).astype(out_ref.dtype)


def feature_fusion(image_features, preference_vector, weight, bias,
                   *, block_b=None,
                   vmem_budget_bytes: int = 24 << 20,
                   single_pass_bytes: int = 16 << 20):
    """image_features: (B, D); preference_vector: (P,); weight: (D, P); bias: (D,)."""
    B, D = image_features.shape
    dtype = image_features.dtype
    in_bytes = jnp.dtype(dtype).itemsize
    pack = _sublane_pack(dtype)

    # Hoisted Linear projection: pref @ W.T + b in f32, cast once to the input
    # dtype (the PyTorch module runs the projection in the input dtype).
    projected = (preference_vector.astype(jnp.float32)
                 @ weight.astype(jnp.float32).T
                 + bias.astype(jnp.float32)).astype(dtype)         # (D,)

    d_pad = _round_up(D, 128)                    # lane-dense last dim -> unmasked vst
    b_min = _round_up(B, pack)

    resident_bytes = 2 * b_min * d_pad * in_bytes                  # img in + fused out
    use_single_pass = (block_b is None) and (resident_bytes <= single_pass_bytes)

    if use_single_pass:
        # ---------------- single-kernel resident path ----------------
        b_pad = b_min
        img_p = jnp.pad(image_features, ((0, b_pad - B), (0, d_pad - D)))
        proj_row = jnp.pad(projected, (0, d_pad - D)).reshape(1, d_pad)

        vmem_limit = int(min(2 * resident_bytes + (4 << 20), 48 << 20))
        fused = pl.pallas_call(
            functools.partial(_fused_single_kernel, valid_b=B),
            out_shape=jax.ShapeDtypeStruct((b_pad, d_pad), dtype),
            grid_spec=pltpu.PrefetchScalarGridSpec(
                num_scalar_prefetch=0,
                grid=(1,),
                in_specs=[pl.BlockSpec((b_pad, d_pad), lambda i: (0, 0)),
                          pl.BlockSpec((1, d_pad), lambda i: (0, 0))],
                out_specs=pl.BlockSpec((b_pad, d_pad), lambda i: (0, 0))),
            compiler_params=pltpu.CompilerParams(
                dimension_semantics=("arbitrary",),
                vmem_limit_bytes=vmem_limit),
        )(img_p, proj_row)
        return fused[:B, :D]

    # ---------------- tiled streaming path ----------------
    # Scores + GLOBAL softmax over B: tiny memory-bound work; XLA already runs
    # this at HBM roofline, and it yields the precomputed per-row weights so the
    # Pallas pass needs no resident scores column or per-tile re-reduction.
    scores = jnp.sum(image_features * projected[None, :], axis=-1)   # (B,), input dtype
    weights = jax.nn.softmax(scores.astype(jnp.float32), axis=-1)    # (B,)  f32

    # Batch tile sized by bytes: ~4 big buffers live (img in + fused out, each
    # double-buffered).  Round to sublane packing; guarantee >=2 grid steps so
    # the "parallel" axis can shard across v7x's two TensorCores.
    if block_b is not None:
        tb = max(pack, _round_up(int(block_b), pack))
    else:
        per_row = 4 * d_pad * in_bytes
        tb = max(pack, (vmem_budget_bytes // per_row) // pack * pack)
        if b_min >= 2 * pack:
            tb = min(tb, max(pack, (b_min // 2) // pack * pack))
    tb = min(tb, b_min)
    b_pad = _round_up(b_min, tb)
    nb = b_pad // tb

    img_p = jnp.pad(image_features, ((0, b_pad - B), (0, d_pad - D)))
    w_col = jnp.pad(weights, (0, b_pad - B)).reshape(b_pad, 1)       # padded rows -> weight 0

    working = 4 * tb * d_pad * in_bytes + 4 * tb * 128 * 4           # img/out tiles + lane-padded weights
    vmem_limit = int(min(working + (4 << 20), 48 << 20))
    # TODO(synk): if profiling shows the stream DMA-exposed for very small D,
    # bump the image-tile spec to pipeline_mode=pl.Buffered(3).
    fused = pl.pallas_call(
        _scale_kernel,
        out_shape=jax.ShapeDtypeStruct((b_pad, d_pad), dtype),
        grid_spec=pltpu.PrefetchScalarGridSpec(
            num_scalar_prefetch=0,
            grid=(nb,),
            in_specs=[pl.BlockSpec((tb, 1), lambda i: (i, 0)),
                      pl.BlockSpec((tb, d_pad), lambda i: (i, 0))],
            out_specs=pl.BlockSpec((tb, d_pad), lambda i: (i, 0))),
        compiler_params=pltpu.CompilerParams(
            dimension_semantics=("parallel",),
            vmem_limit_bytes=vmem_limit),
    )(w_col, img_p)
    return fused[:B, :D]


def _reference(image_features, preference_vector, weight, bias):
    # Pure-JAX mirror of the PyTorch forward (everything in the input dtype).
    B = image_features.shape[0]
    dtype = image_features.dtype
    pref = jnp.broadcast_to(preference_vector.astype(dtype),
                            (B, preference_vector.shape[0]))
    projected = pref @ weight.astype(dtype).T + bias.astype(dtype)   # (B, D)
    scores = jnp.sum(image_features * projected, axis=-1)            # (B,)
    w = jax.nn.softmax(scores, axis=-1)                              # softmax over batch
    return image_features * w[:, None]


if __name__ == "__main__":
    key = jax.random.PRNGKey(0)

    # --- small module-consistent case (exercises the single-kernel resident path) ---
    batch, image_feature_dim, preference_vector_dim = 2, 32, 16
    k_img, k_pref, k_w, k_b, k2 = jax.random.split(key, 5)
    image_features = jax.random.normal(k_img, (batch, image_feature_dim), jnp.float32)
    preference_vector = jax.random.normal(k_pref, (preference_vector_dim,), jnp.float32)
    weight = jax.random.normal(k_w, (image_feature_dim, preference_vector_dim), jnp.float32) * 0.1
    bias = jax.random.normal(k_b, (image_feature_dim,), jnp.float32) * 0.1

    out = jax.block_until_ready(
        feature_fusion(image_features, preference_vector, weight, bias))
    ref = _reference(image_features, preference_vector, weight, bias)
    assert out.shape == (batch, image_feature_dim)
    assert jnp.allclose(out, ref, atol=1e-5, rtol=1e-5), "mismatch vs reference (single-pass path)"

    # --- second case exercising the tiled streaming path (3 batch tiles + padding) ---
    B2, D2, P2 = 20, 160, 16
    k_img2, k_pref2, k_w2, k_b2 = jax.random.split(k2, 4)
    img2 = jax.random.normal(k_img2, (B2, D2), jnp.float32)
    pref2 = jax.random.normal(k_pref2, (P2,), jnp.float32)
    w2 = jax.random.normal(k_w2, (D2, P2), jnp.float32) * 0.1
    b2 = jax.random.normal(k_b2, (D2,), jnp.float32) * 0.1

    out2 = jax.block_until_ready(feature_fusion(img2, pref2, w2, b2, block_b=8))
    ref2 = _reference(img2, pref2, w2, b2)
    assert out2.shape == (B2, D2)
    assert jnp.allclose(out2, ref2, atol=1e-5, rtol=1e-5), "mismatch vs reference (tiled path)"

    print("KERNEL_OK")
</pallas_src>

<mosaic_0001>
module attributes {stable_mosaic.version = 11 : i64} {
  func.func @_fused_single_kernel(%arg0: i32, %arg1: memref<8x128xf32, #tpu.memory_space<vmem>>, %arg2: memref<1x128xf32, #tpu.memory_space<vmem>>, %arg3: memref<8x128xf32, #tpu.memory_space<vmem>>) attributes {dimension_semantics = [#tpu.dimension_semantics<arbitrary>], iteration_bounds = array<i64: 1>, scalar_prefetch = 0 : i64, scratch_operands = 0 : i64, tpu.core_type = #tpu.core_type<tc>, window_params = [{pipeline_mode = #tpu.pipeline_mode<synchronous>, transform_indices = @transform_0, window_bounds = array<i64: 8, 128>}, {pipeline_mode = #tpu.pipeline_mode<synchronous>, transform_indices = @transform_1, window_bounds = array<i64: 1, 128>}, {pipeline_mode = #tpu.pipeline_mode<synchronous>, transform_indices = @transform_2, window_bounds = array<i64: 8, 128>}]} {
    %c0 = arith.constant 0 : index
    %c0_0 = arith.constant 0 : index
    %0 = vector.load %arg1[%c0, %c0_0] : memref<8x128xf32, #tpu.memory_space<vmem>>, vector<8x128xf32>
    %c0_1 = arith.constant 0 : index
    %c0_2 = arith.constant 0 : index
    %1 = vector.load %arg2[%c0_1, %c0_2] : memref<1x128xf32, #tpu.memory_space<vmem>>, vector<1x128xf32>
    %2 = vector.broadcast %1 : vector<1x128xf32> to vector<8x128xf32>
    %3 = arith.mulf %0, %2 : vector<8x128xf32>
    %cst = arith.constant dense<0.000000e+00> : vector<8xf32>
    %4 = vector.multi_reduction <add>, %3, %cst [1] : vector<8x128xf32> to vector<8xf32>
    %5 = vector.shape_cast %4 : vector<8xf32> to vector<8x1xf32>
    %6 = tpu.iota {dimensions = array<i32: 0>} : vector<8x1xi32>
    %c2_i32 = arith.constant 2 : i32
    %7 = vector.broadcast %c2_i32 : i32 to vector<8x1xi32>
    %8 = arith.cmpi slt, %6, %7 : vector<8x1xi32>
    %cst_3 = arith.constant 0xFF800000 : f32
    %9 = vector.broadcast %cst_3 : f32 to vector<8x1xf32>
    %10 = arith.select %8, %5, %9 : vector<8x1xi1>, vector<8x1xf32>
    %cst_4 = arith.constant dense<0xFF800000> : vector<1xf32>
    %11 = vector.multi_reduction <maximumf>, %10, %cst_4 [0] : vector<8x1xf32> to vector<1xf32>
    %12 = vector.shape_cast %11 : vector<1xf32> to vector<1x1xf32>
    %13 = vector.broadcast %12 : vector<1x1xf32> to vector<8x1xf32>
    %14 = arith.subf %10, %13 : vector<8x1xf32>
    %15 = math.exp %14 : vector<8x1xf32>
    %cst_5 = arith.constant dense<0.000000e+00> : vector<1xf32>
    %16 = vector.multi_reduction <add>, %15, %cst_5 [0] : vector<8x1xf32> to vector<1xf32>
    %17 = vector.shape_cast %16 : vector<1xf32> to vector<1x1xf32>
    %18 = tpu.reciprocal %17 : vector<1x1xf32> -> vector<1x1xf32>
    %19 = vector.broadcast %18 : vector<1x1xf32> to vector<8x1xf32>
    %20 = arith.mulf %15, %19 : vector<8x1xf32>
    %21 = vector.broadcast %20 : vector<8x1xf32> to vector<8x128xf32>
    %22 = arith.mulf %0, %21 : vector<8x128xf32>
    %c0_6 = arith.constant 0 : index
    %c0_7 = arith.constant 0 : index
    %23 = vector.load %arg3[%c0_6, %c0_7] : memref<8x128xf32, #tpu.memory_space<vmem>>, vector<8x128xf32>
    tpu.vector_store %arg3[%c0_6, %c0_7], %22 {strides = array<i32>} : memref<8x128xf32, #tpu.memory_space<vmem>>, vector<8x128xf32>,
    return
  }
  func.func @transform_0(%arg0: i32) -> (i32, i32) {
    %c0_i32 = arith.constant 0 : i32
    %c0_i32_0 = arith.constant 0 : i32
    %c0_i32_1 = arith.constant 0 : i32
    return %c0_i32, %c0_i32_0 : i32, i32
  }
  func.func @transform_1(%arg0: i32) -> (i32, i32) {
    %c0_i32 = arith.constant 0 : i32
    %c0_i32_0 = arith.constant 0 : i32
    %c0_i32_1 = arith.constant 0 : i32
    return %c0_i32, %c0_i32_0 : i32, i32
  }
  func.func @transform_2(%arg0: i32) -> (i32, i32) {
    %c0_i32 = arith.constant 0 : i32
    %c0_i32_0 = arith.constant 0 : i32
    %c0_i32_1 = arith.constant 0 : i32
    return %c0_i32, %c0_i32_0 : i32, i32
  }
}

</mosaic_0001>

<bundles_post_ra>
// kernel: tpu_custom_call.1
= control target key start
LH: loop header
LB: loop body
LE: loop exit
PB: predicated region body
PF: predicated region fallthrough
CT: control target
= control target key end

     0   :  { %7 = vsyncpa [#allocation3], 0  ;;  %s172_s0 = inlined_call_operand.hbm [shape: f32[8,128], index: 0, kind: input, shape index: {}]   ;;  %s173_s1 = inlined_call_operand.vmem [shape: f32[1,128], index: 1, kind: input, shape index: {}]   ;;  %s174_s2 = inlined_call_operand.hbm [shape: f32[8,128], index: 2, kind: output, shape index: {}]  }
   0x1   :  { %8 = vsyncpa [#allocation4], 0  ;;  %s128_s9 = smov [#allocation2]   ;;  %s80_s13 = scalar_lea.hbm %s172_s0, 128 }
   0x2   :  { %s15_s10 = sshll.u32 %s128_s9, 4  ;;  %p81_p0 = scmp.ne.s32.totalorder %s172_s0, %s80_s13  ;;  %s16_s10 = int_to_ptr.vmem [resolvable:$true] %s15_s10 }
   0x3   :  { %p84_p1 = scmp.lt.u32.totalorder %s80_s13, %s172_s0 }
   0x5   :  { %p86_p2 = pnand %p84_p1, %p81_p0 }
   0x7   :  { %89 = shalt.err (!%p86_p2)
}
   0x8   :  { %s90_s18 = scalar_lea.vmem %s16_s10, 128  ;;  %p95_p4 = scmp.lt.s32.totalorder %s16_s10, %s16_s10 }
   0x9   :  { %p91_p3 = scmp.ne.s32.totalorder %s16_s10, %s90_s18  ;;  %p96_p5 = scmp.lt.s32.totalorder %s90_s18, %s90_s18 }
   0xb   :  { %p97_p6 = por %p96_p5, %p95_p4 }
   0xd   :  { %p98_p7 = pnand %p97_p6, %p91_p3 }
   0xf   :  { %101 = shalt.err (!%p98_p7)
}
  0x10   :  { %18 = dma.hbm_to_vmem [thread:$0]  %s172_s0, 128, %s16_s10, [#allocation3]  }
  0x11   :  { %124 = dma.done.wait [#allocation3], 128  }
  0x12   :  { %125 = vsyncadd [#allocation3], 4294967168  ;;  %v24_v0 = vld [vmem:[#allocation2] sm:$0xff]  ;;  %v35_v3 = vlaneseq  ;;  %s129_s0 = smov [#allocation5]  }
  0x13   :  { %v73_v1 = vld [vmem:[%s173_s1] ss:$0 sm:$0xff]  ;;  %s64_s1 = sshll.u32 %s129_s0, 4  ;;  %s65_s1 = int_to_ptr.vmem [resolvable:$true] %s64_s1 }
  0x14   :  { %v32_v2 = vmul.f32 %v73_v1, %v24_v0  ;;  %v36_v4 = vshrl.u32 %v35_v3, 7  ;;  %s102_s23 = scalar_lea.vmem %s65_s1, 128  ;;  %p107_p9 = scmp.lt.s32.totalorder %s65_s1, %s65_s1 }
  0x15   :  { %p103_p8 = scmp.ne.s32.totalorder %s65_s1, %s102_s23  ;;  %p108_p10 = scmp.lt.s32.totalorder %s102_s23, %s102_s23 }
  0x16   :  { %33 = vadd.xlane.f32.xlu0 %v32_v2  ;;  %vm37_vm0 = vcmp.lt.s32.totalorder %v36_v4, 2 }
  0x17   :  { %p109_p11 = por %p108_p10, %p107_p9 }
  0x19   :  { %p110_p12 = pnand %p109_p11, %p103_p8 }
  0xa3   :  { %v34_v5 = vpop.xlane.xlu0 %33 }
  0xa4   :  { %v38_v6 = vsel %vm37_vm0, %v34_v5, -inf }
  0xa5   :  { %v39_v7 = vrot.slane %v38_v6, 4 }
  0xa7   :  { %v40_v8 = vmax.f32 %v38_v6, %v39_v7 }
  0xa9   :  { %v41_v9 = vrot.slane %v40_v8, 2 }
  0xab   :  { %v42_v10 = vmax.f32 %v40_v8, %v41_v9 }
  0xad   :  { %v43_v11 = vrot.slane %v42_v10, 1 }
  0xaf   :  { %v44_v12 = vmax.f32 %v42_v10, %v43_v11 }
  0xb1   :  { %v45_v13 = vsub.f32 %v38_v6, %v44_v12 }
  0xb3   :  { %v46_v14 = vmul.f32 1.442695, %v45_v13 }
  0xb5   :  { %76 = vpow2.f32 %v46_v14 }
  0xbf   :  { %v77_v15 = vpop.eup %76 }
  0xc0   :  { %v48_v16 = vrot.slane %v77_v15, 4 }
  0xc2   :  { %v49_v17 = vadd.f32 %v77_v15, %v48_v16 }
  0xc4   :  { %v50_v18 = vrot.slane %v49_v17, 2 }
  0xc6   :  { %v51_v19 = vadd.f32 %v50_v18, %v49_v17 }
  0xc8   :  { %v52_v20 = vrot.slane %v51_v19, 1 }
  0xca   :  { %v53_v21 = vadd.f32 %v52_v20, %v51_v19 }
  0xcc   :  { %78 = vrcp.f32 %v53_v21 }
  0xd6   :  { %v79_v22 = vpop.eup %78 }
  0xd7   :  { %v55_v23 = vmul.f32 %v79_v22, %v77_v15 }
  0xd9   :  { %v56_v24 = vmul.f32 %v55_v23, %v24_v0 }
  0xdb   :  { %57 = vst [vmem:[#allocation5] sm:$0xff] %v56_v24 }
  0xdc   :  { %113 = shalt.err (!%p110_p12)
}
  0xdd   :  { %s114_s26 = scalar_lea.hbm %s174_s2, 128 }
  0xde   :  { %p115_p13 = scmp.ne.s32.totalorder %s174_s2, %s114_s26  ;;  %p118_p0 = scmp.lt.u32.totalorder %s114_s26, %s174_s2 }
  0xe0   :  { %p120_p1 = pnand %p118_p0, %p115_p13 }
  0xe2   :  { %123 = shalt.err (!%p120_p1)
}
  0xe3   :  { %67 = dma.vmem_to_hbm [thread:$0]  %s65_s1, 128, %s174_s2, [#allocation4]  }
  0xe4   :  { %126 = dma.done.wait [#allocation4], 128  }
  0xe5   :  { %127 = vsyncadd [#allocation4], 4294967168 }
  0xe6   :  { %71 = vsyncpa [#allocation3], 1 }
  0xe7   :  { %72 = vsyncpa [#allocation4], 1 }

</bundles_post_ra>
